<compile_context>
chip_gen: v5e
topology: v5e:2x2
jax: 0.10.0
libtpu: 0.0.40
codegen_flags: <defaults>
</compile_context>

<pallas_src>
import functools

import jax
import jax.numpy as jnp
from jax.experimental import pallas as pl
from jax.experimental.pallas import tpu as pltpu


def _round_up(x, m):
    return ((x + m - 1) // m) * m


def _padded_vmem_bytes(rows, cols, itemsize):
    """Bytes a (rows, cols) VMEM buffer occupies after (8, 128) tile padding."""
    return _round_up(max(int(rows), 1), 8) * _round_up(max(int(cols), 1), 128) * itemsize


def _default_tile_bytes():
    """Generation-aware streaming tile size for x."""
    try:
        info = pltpu.get_tpu_info()
        vmem_cap = int(getattr(info, "vmem_capacity_bytes", 0) or 0)
        if 0 < vmem_cap <= (96 << 20):
            # v7x-class core (64 MiB VMEM, ~3.2 TB/s HBM): bigger tiles to
            # amortize the ~0.35us per-grid-step overhead (4 MiB -> ~20% ovh).
            return 16 << 20
    except Exception:
        pass
    # v5e / v6e (128 MiB VMEM): 8 MiB already sits at the HBM-roofline knee.
    return 8 << 20


def _linear(x, w_t, bias):
    """y = x @ w_t + bias.  x: (TB, C) f32, w_t: (C, C) f32 pre-transposed
    (in, out), bias: (1, C) f32."""
    c = x.shape[-1]
    if c >= 128:
        return jnp.dot(x, w_t, preferred_element_type=jnp.float32) + bias
    # Tiny C: a CxC matmul fills <1% of the MXU and only adds push/pop latency
    # to the serial epilogue -> unrolled VPU broadcast multiply-accumulate.
    acc = bias
    for k in range(c):
        acc = acc + x[:, k:k + 1] * w_t[k:k + 1, :]
    return acc


def channel_attention_kernel(x_ref, w1t_ref, b1_ref, w2t_ref, b2_ref,
                             out_ref, acc_ref, *, inv_s):
    """Grid (B, n_s): streams lane-dense spatial tiles, f32-accumulates the
    spatial sum, and runs the tiny MLP + softmax epilogue on the last step."""
    s = pl.program_id(1)

    @pl.when(s == 0)
    def _init():
        acc_ref[...] = jnp.zeros_like(acc_ref)

    # Streaming partial sum over the (8k, 128)-dense tile, accumulated in f32.
    part = jnp.sum(x_ref[...].astype(jnp.float32), axis=-1)   # (1, C, ts/128)
    acc_ref[...] += jnp.sum(part, axis=-1)                    # (1, C)

    @pl.when(s == pl.num_programs(1) - 1)
    def _epilogue():
        x_avg = acc_ref[...] * inv_s                              # (1, C)  true-S mean
        h = jnp.tanh(_linear(x_avg, w1t_ref[...], b1_ref[...]))  # fc1 + tanh
        logits = _linear(h, w2t_ref[...], b2_ref[...])           # fc2
        m = jnp.max(logits, axis=-1, keepdims=True)
        e = jnp.exp(logits - m)
        denom = jnp.sum(e, axis=-1, keepdims=True)
        attn = e * pl.reciprocal(denom, approx=False)            # softmax over channels
        out_ref[...] = attn.reshape(out_ref.shape)


def partial_sum_kernel(x_ref, out_ref, acc_ref):
    """Grid (2, n_half): per-split f32 spatial partial sums (B == 1 path)."""
    s = pl.program_id(1)

    @pl.when(s == 0)
    def _init():
        acc_ref[...] = jnp.zeros_like(acc_ref)

    part = jnp.sum(x_ref[...].astype(jnp.float32), axis=-1)   # (1, C, ts/128)
    acc_ref[...] += jnp.sum(part, axis=-1)                    # (1, C)

    @pl.when(s == pl.num_programs(1) - 1)
    def _store():
        out_ref[...] = acc_ref[...].reshape(out_ref.shape)


def channel_attention(x, w1, b1, w2, b2, *, target_tile_bytes=None):
    """x: (B, C, H, W, D) (any float dtype, streamed natively).
    w1, w2: (C, C) PyTorch Linear layout (out, in).  b1, b2: (C,).
    Returns (B, C, 1, 1, 1) f32 softmax attention weights (ChannelAttention.forward).
    """
    B, C, H, W, D = x.shape
    S = H * W * D
    itemsize = jnp.dtype(x.dtype).itemsize

    # Tile granularity so ts/128 is a multiple of the packed-sublane count
    # (8 for f32, 16 for bf16, 32 for int8) -> fully dense VMEM tiles.
    sub_mult = 8 * max(4 // itemsize, 1)
    gran = 128 * sub_mult

    if target_tile_bytes is None:
        target_tile_bytes = _default_tile_bytes()

    max_elems = max(int(target_tile_bytes) // (C * itemsize), gran)
    ts = max((max_elems // gran) * gran, gran)
    ts = min(ts, _round_up(S, gran))          # never bigger than padded S

    s_pad = _round_up(S, ts)
    n_s = s_pad // ts

    # v7x: with B == 1 the only parallel axis is size-1, idling the second
    # TensorCore.  Split the spatial reduction 2 ways (parallel axis) and
    # finish the microscopic (1, C) MLP + softmax in plain JAX.
    split = 2 if (B == 1 and n_s >= 2) else 1
    if split == 2:
        s_pad = _round_up(S, 2 * ts)
        n_s = s_pad // ts

    # Zero-pad S (cheap XLA pad); the mean divides by the TRUE S below, so the
    # zero padding does not bias it.
    x_flat = x.reshape(B, C, S)
    if s_pad != S:
        x_flat = jnp.pad(x_flat, ((0, 0), (0, 0), (0, s_pad - S)))
    x_view = x_flat.reshape(B, C, s_pad // 128, 128)

    inv_s = float(1.0 / S)
    tsb = ts // 128

    # Glue: pre-transpose Linear weights, make biases 2-D for broadcasting.
    w1t = jnp.asarray(w1, jnp.float32).T
    w2t = jnp.asarray(w2, jnp.float32).T
    b1r = jnp.asarray(b1, jnp.float32).reshape(1, C)
    b2r = jnp.asarray(b2, jnp.float32).reshape(1, C)

    # Padded VMEM footprint accounting (for vmem_limit_bytes).
    x_tile_bytes = C * ts * itemsize                 # dense (last-two dims (8k,128))
    w_pad = _padded_vmem_bytes(C, C, 4)
    vec_pad = _padded_vmem_bytes(1, C, 4)            # bias / out tile / scratch

    if split == 1:
        vmem_limit = int(2 * x_tile_bytes            # double-buffered x tiles
                         + 2 * 2 * w_pad             # w1t, w2t (double-buffered)
                         + 2 * 2 * vec_pad           # b1, b2
                         + 2 * vec_pad               # output tile
                         + vec_pad                   # f32 accumulator scratch
                         + (2 << 20))                # headroom
        cost = pl.CostEstimate(
            flops=2 * B * C * s_pad + 4 * B * C * C + 8 * B * C,
            transcendentals=2 * B * C,               # tanh + exp
            bytes_accessed=B * C * s_pad * itemsize + 2 * C * C * 4
                           + 2 * C * 4 + B * C * 4,
        )
        grid_spec = pltpu.PrefetchScalarGridSpec(
            num_scalar_prefetch=0,
            grid=(B, n_s),
            in_specs=[
                # Streamed, double-buffered, (8,128)-dense spatial tiles of x.
                pl.BlockSpec((1, C, tsb, 128), lambda b, s: (b, 0, s, 0)),
                # Weights / biases: constant block index -> DMA'd once, resident.
                pl.BlockSpec((C, C), lambda b, s: (0, 0)),
                pl.BlockSpec((1, C), lambda b, s: (0, 0)),
                pl.BlockSpec((C, C), lambda b, s: (0, 0)),
                pl.BlockSpec((1, C), lambda b, s: (0, 0)),
            ],
            out_specs=pl.BlockSpec((1, 1, C), lambda b, s: (b, 0, 0)),
            scratch_shapes=[pltpu.VMEM((1, C), jnp.float32)],
        )
        attn = pl.pallas_call(
            functools.partial(channel_attention_kernel, inv_s=inv_s),
            out_shape=jax.ShapeDtypeStruct((B, 1, C), jnp.float32),
            grid_spec=grid_spec,
            compiler_params=pltpu.CompilerParams(
                dimension_semantics=("parallel", "arbitrary"),
                vmem_limit_bytes=vmem_limit,
            ),
            cost_estimate=cost,
        )(x_view, w1t, b1r, w2t, b2r)
        # attention_weights.unsqueeze(-1).unsqueeze(-1).unsqueeze(-1)
        return attn.reshape(B, C, 1, 1, 1)

    # ---------------- B == 1: 2-way spatial split across cores ----------------
    n_half = n_s // 2
    vmem_limit = int(2 * x_tile_bytes + 2 * vec_pad + vec_pad + (2 << 20))
    cost = pl.CostEstimate(
        flops=2 * C * s_pad,
        transcendentals=0,
        bytes_accessed=C * s_pad * itemsize + 2 * C * 4,
    )
    grid_spec = pltpu.PrefetchScalarGridSpec(
        num_scalar_prefetch=0,
        grid=(2, n_half),
        in_specs=[pl.BlockSpec((1, C, tsb, 128),
                               lambda p, s: (0, 0, p * n_half + s, 0))],
        out_specs=pl.BlockSpec((1, 1, C), lambda p, s: (p, 0, 0)),
        scratch_shapes=[pltpu.VMEM((1, C), jnp.float32)],
    )
    partial = pl.pallas_call(
        partial_sum_kernel,
        out_shape=jax.ShapeDtypeStruct((2, 1, C), jnp.float32),
        grid_spec=grid_spec,
        compiler_params=pltpu.CompilerParams(
            dimension_semantics=("parallel", "arbitrary"),
            vmem_limit_bytes=vmem_limit,
        ),
        cost_estimate=cost,
    )(x_view)
    # Microscopic (1, C) epilogue in plain JAX.
    x_avg = partial.sum(axis=0) * inv_s                         # (1, C)
    h = jnp.tanh(x_avg @ w1t + b1r)
    logits = h @ w2t + b2r
    attn = jax.nn.softmax(logits, axis=-1)
    return attn.reshape(B, C, 1, 1, 1)


if __name__ == "__main__":
    key = jax.random.PRNGKey(0)
    kx, kw1, kb1, kw2, kb2, kx2, kx3 = jax.random.split(key, 7)

    def reference(x, w1, b1, w2, b2):
        B, C = x.shape[0], x.shape[1]
        x_avg = x.astype(jnp.float32).mean(axis=(2, 3, 4))
        h = jnp.tanh(x_avg @ w1.T + b1)
        return jax.nn.softmax(h @ w2.T + b2, axis=1).reshape(B, C, 1, 1, 1)

    # Deterministic synthetic parameters (PyTorch Linear shapes: (out, in), (out,)).
    C = 4
    bound = 1.0 / float(C) ** 0.5
    w1 = jax.random.uniform(kw1, (C, C), minval=-bound, maxval=bound, dtype=jnp.float32)
    b1 = jax.random.uniform(kb1, (C,), minval=-bound, maxval=bound, dtype=jnp.float32)
    w2 = jax.random.uniform(kw2, (C, C), minval=-bound, maxval=bound, dtype=jnp.float32)
    b2 = jax.random.uniform(kb2, (C,), minval=-bound, maxval=bound, dtype=jnp.float32)

    ok = True

    # Case 1: default tiling, B=2, C=4, S=512 (zero-padded to one 1024 tile).
    x1 = jax.random.normal(kx, (2, C, 8, 8, 8), dtype=jnp.float32)
    out1 = jax.block_until_ready(channel_attention(x1, w1, b1, w2, b2))
    ok &= bool(jnp.allclose(out1, reference(x1, w1, b1, w2, b2), atol=1e-5, rtol=1e-5))
    ok &= out1.shape == (2, C, 1, 1, 1)

    # Case 2: B=1 -> 2-way spatial split (v7x second TensorCore), streamed tiles.
    x2 = jax.random.normal(kx2, (1, C, 16, 16, 16), dtype=jnp.float32)
    out2 = jax.block_until_ready(
        channel_attention(x2, w1, b1, w2, b2, target_tile_bytes=16 * 1024))
    ok &= bool(jnp.allclose(out2, reference(x2, w1, b1, w2, b2), atol=1e-5, rtol=1e-5))
    ok &= out2.shape == (1, C, 1, 1, 1)

    # Case 3: non-divisible S (zero-padded) + multi-step in-kernel accumulation.
    x3 = jax.random.normal(kx3, (2, C, 10, 10, 25), dtype=jnp.float32)
    out3 = jax.block_until_ready(
        channel_attention(x3, w1, b1, w2, b2, target_tile_bytes=16 * 1024))
    ok &= bool(jnp.allclose(out3, reference(x3, w1, b1, w2, b2), atol=1e-5, rtol=1e-5))
    ok &= out3.shape == (2, C, 1, 1, 1)

    assert ok
    print("KERNEL_OK")
</pallas_src>

<mosaic_0001>
module attributes {stable_mosaic.version = 11 : i64} {
  func.func @channel_attention_kernel(%arg0: i32, %arg1: i32, %arg2: memref<1x4x8x128xf32, #tpu.memory_space<vmem>>, %arg3: memref<4x4xf32, #tpu.memory_space<vmem>>, %arg4: memref<1x4xf32, #tpu.memory_space<vmem>>, %arg5: memref<4x4xf32, #tpu.memory_space<vmem>>, %arg6: memref<1x4xf32, #tpu.memory_space<vmem>>, %arg7: memref<1x1x4xf32, #tpu.memory_space<vmem>>, %arg8: memref<1x4xf32, #tpu.memory_space<vmem>>) attributes {dimension_semantics = [#tpu.dimension_semantics<parallel>, #tpu.dimension_semantics<arbitrary>], iteration_bounds = array<i64: 2, 1>, scalar_prefetch = 0 : i64, scratch_operands = 1 : i64, tpu.core_type = #tpu.core_type<tc>, window_params = [{transform_indices = @transform_0, window_bounds = array<i64: 1, 4, 8, 128>}, {pipeline_mode = #tpu.pipeline_mode<synchronous>, transform_indices = @transform_1, window_bounds = array<i64: 4, 4>}, {pipeline_mode = #tpu.pipeline_mode<synchronous>, transform_indices = @transform_2, window_bounds = array<i64: 1, 4>}, {pipeline_mode = #tpu.pipeline_mode<synchronous>, transform_indices = @transform_3, window_bounds = array<i64: 4, 4>}, {pipeline_mode = #tpu.pipeline_mode<synchronous>, transform_indices = @transform_4, window_bounds = array<i64: 1, 4>}, {transform_indices = @transform_5, window_bounds = array<i64: 1, 1, 4>}]} {
    %c0_i32 = arith.constant 0 : i32
    %0 = arith.cmpi eq, %arg1, %c0_i32 : i32
    %1 = arith.extui %0 : i1 to i32
    %c0_i32_0 = arith.constant 0 : i32
    %2 = arith.cmpi ne, %1, %c0_i32_0 : i32
    scf.if %2 {
      %cst_11 = arith.constant 0.000000e+00 : f32
      %12 = vector.broadcast %cst_11 : f32 to vector<1x4xf32>
      %c0_12 = arith.constant 0 : index
      %c0_13 = arith.constant 0 : index
      %13 = vector.load %arg8[%c0_12, %c0_13] : memref<1x4xf32, #tpu.memory_space<vmem>>, vector<1x4xf32>
      tpu.vector_store %arg8[%c0_12, %c0_13], %12 {strides = array<i32>} : memref<1x4xf32, #tpu.memory_space<vmem>>, vector<1x4xf32>,
    } else {
    }
    %c0 = arith.constant 0 : index
    %c0_1 = arith.constant 0 : index
    %c0_2 = arith.constant 0 : index
    %c0_3 = arith.constant 0 : index
    %3 = vector.load %arg2[%c0, %c0_1, %c0_2, %c0_3] : memref<1x4x8x128xf32, #tpu.memory_space<vmem>>, vector<1x4x8x128xf32>
    %cst = arith.constant dense<0.000000e+00> : vector<1x4x8xf32>
    %4 = vector.multi_reduction <add>, %3, %cst [3] : vector<1x4x8x128xf32> to vector<1x4x8xf32>
    %c0_4 = arith.constant 0 : index
    %c0_5 = arith.constant 0 : index
    %5 = vector.load %arg8[%c0_4, %c0_5] : memref<1x4xf32, #tpu.memory_space<vmem>>, vector<1x4xf32>
    %cst_6 = arith.constant dense<0.000000e+00> : vector<1x4xf32>
    %6 = vector.multi_reduction <add>, %4, %cst_6 [2] : vector<1x4x8xf32> to vector<1x4xf32>
    %7 = arith.addf %5, %6 : vector<1x4xf32>
    %c0_7 = arith.constant 0 : index
    %c0_8 = arith.constant 0 : index
    %8 = vector.load %arg8[%c0_7, %c0_8] : memref<1x4xf32, #tpu.memory_space<vmem>>, vector<1x4xf32>
    tpu.vector_store %arg8[%c0_7, %c0_8], %7 {strides = array<i32>} : memref<1x4xf32, #tpu.memory_space<vmem>>, vector<1x4xf32>,
    %c0_i32_9 = arith.constant 0 : i32
    %9 = arith.cmpi eq, %arg1, %c0_i32_9 : i32
    %10 = arith.extui %9 : i1 to i32
    %c0_i32_10 = arith.constant 0 : i32
    %11 = arith.cmpi ne, %10, %c0_i32_10 : i32
    scf.if %11 {
      %c0_11 = arith.constant 0 : index
      %c0_12 = arith.constant 0 : index
      %12 = vector.load %arg8[%c0_11, %c0_12] : memref<1x4xf32, #tpu.memory_space<vmem>>, vector<1x4xf32>
      %cst_13 = arith.constant 0.001953125 : f32
      %13 = vector.broadcast %cst_13 : f32 to vector<1x4xf32>
      %14 = arith.mulf %12, %13 : vector<1x4xf32>
      %c0_14 = arith.constant 0 : index
      %c0_15 = arith.constant 0 : index
      %15 = vector.load %arg3[%c0_14, %c0_15] : memref<4x4xf32, #tpu.memory_space<vmem>>, vector<4x4xf32>
      %c0_16 = arith.constant 0 : index
      %c0_17 = arith.constant 0 : index
      %16 = vector.load %arg4[%c0_16, %c0_17] : memref<1x4xf32, #tpu.memory_space<vmem>>, vector<1x4xf32>
      %17 = vector.extract_strided_slice %14 {offsets = [0, 0], sizes = [1, 1], strides = [1, 1]} : vector<1x4xf32> to vector<1x1xf32>
      %18 = vector.extract_strided_slice %15 {offsets = [0, 0], sizes = [1, 4], strides = [1, 1]} : vector<4x4xf32> to vector<1x4xf32>
      %19 = vector.broadcast %17 : vector<1x1xf32> to vector<1x4xf32>
      %20 = arith.mulf %19, %18 : vector<1x4xf32>
      %21 = arith.addf %16, %20 : vector<1x4xf32>
      %22 = vector.extract_strided_slice %14 {offsets = [0, 1], sizes = [1, 1], strides = [1, 1]} : vector<1x4xf32> to vector<1x1xf32>
      %23 = vector.extract_strided_slice %15 {offsets = [1, 0], sizes = [1, 4], strides = [1, 1]} : vector<4x4xf32> to vector<1x4xf32>
      %24 = vector.broadcast %22 : vector<1x1xf32> to vector<1x4xf32>
      %25 = arith.mulf %24, %23 : vector<1x4xf32>
      %26 = arith.addf %21, %25 : vector<1x4xf32>
      %27 = vector.extract_strided_slice %14 {offsets = [0, 2], sizes = [1, 1], strides = [1, 1]} : vector<1x4xf32> to vector<1x1xf32>
      %28 = vector.extract_strided_slice %15 {offsets = [2, 0], sizes = [1, 4], strides = [1, 1]} : vector<4x4xf32> to vector<1x4xf32>
      %29 = vector.broadcast %27 : vector<1x1xf32> to vector<1x4xf32>
      %30 = arith.mulf %29, %28 : vector<1x4xf32>
      %31 = arith.addf %26, %30 : vector<1x4xf32>
      %32 = vector.extract_strided_slice %14 {offsets = [0, 3], sizes = [1, 1], strides = [1, 1]} : vector<1x4xf32> to vector<1x1xf32>
      %33 = vector.extract_strided_slice %15 {offsets = [3, 0], sizes = [1, 4], strides = [1, 1]} : vector<4x4xf32> to vector<1x4xf32>
      %34 = vector.broadcast %32 : vector<1x1xf32> to vector<1x4xf32>
      %35 = arith.mulf %34, %33 : vector<1x4xf32>
      %36 = arith.addf %31, %35 : vector<1x4xf32>
      %37 = math.tanh %36 : vector<1x4xf32>
      %c0_18 = arith.constant 0 : index
      %c0_19 = arith.constant 0 : index
      %38 = vector.load %arg5[%c0_18, %c0_19] : memref<4x4xf32, #tpu.memory_space<vmem>>, vector<4x4xf32>
      %c0_20 = arith.constant 0 : index
      %c0_21 = arith.constant 0 : index
      %39 = vector.load %arg6[%c0_20, %c0_21] : memref<1x4xf32, #tpu.memory_space<vmem>>, vector<1x4xf32>
      %40 = vector.extract_strided_slice %37 {offsets = [0, 0], sizes = [1, 1], strides = [1, 1]} : vector<1x4xf32> to vector<1x1xf32>
      %41 = vector.extract_strided_slice %38 {offsets = [0, 0], sizes = [1, 4], strides = [1, 1]} : vector<4x4xf32> to vector<1x4xf32>
      %42 = vector.broadcast %40 : vector<1x1xf32> to vector<1x4xf32>
      %43 = arith.mulf %42, %41 : vector<1x4xf32>
      %44 = arith.addf %39, %43 : vector<1x4xf32>
      %45 = vector.extract_strided_slice %37 {offsets = [0, 1], sizes = [1, 1], strides = [1, 1]} : vector<1x4xf32> to vector<1x1xf32>
      %46 = vector.extract_strided_slice %38 {offsets = [1, 0], sizes = [1, 4], strides = [1, 1]} : vector<4x4xf32> to vector<1x4xf32>
      %47 = vector.broadcast %45 : vector<1x1xf32> to vector<1x4xf32>
      %48 = arith.mulf %47, %46 : vector<1x4xf32>
      %49 = arith.addf %44, %48 : vector<1x4xf32>
      %50 = vector.extract_strided_slice %37 {offsets = [0, 2], sizes = [1, 1], strides = [1, 1]} : vector<1x4xf32> to vector<1x1xf32>
      %51 = vector.extract_strided_slice %38 {offsets = [2, 0], sizes = [1, 4], strides = [1, 1]} : vector<4x4xf32> to vector<1x4xf32>
      %52 = vector.broadcast %50 : vector<1x1xf32> to vector<1x4xf32>
      %53 = arith.mulf %52, %51 : vector<1x4xf32>
      %54 = arith.addf %49, %53 : vector<1x4xf32>
      %55 = vector.extract_strided_slice %37 {offsets = [0, 3], sizes = [1, 1], strides = [1, 1]} : vector<1x4xf32> to vector<1x1xf32>
      %56 = vector.extract_strided_slice %38 {offsets = [3, 0], sizes = [1, 4], strides = [1, 1]} : vector<4x4xf32> to vector<1x4xf32>
      %57 = vector.broadcast %55 : vector<1x1xf32> to vector<1x4xf32>
      %58 = arith.mulf %57, %56 : vector<1x4xf32>
      %59 = arith.addf %54, %58 : vector<1x4xf32>
      %cst_22 = arith.constant dense<0xFF800000> : vector<1xf32>
      %60 = vector.multi_reduction <maximumf>, %59, %cst_22 [1] : vector<1x4xf32> to vector<1xf32>
      %61 = vector.shape_cast %60 : vector<1xf32> to vector<1x1xf32>
      %62 = vector.broadcast %61 : vector<1x1xf32> to vector<1x4xf32>
      %63 = arith.subf %59, %62 : vector<1x4xf32>
      %64 = math.exp %63 : vector<1x4xf32>
      %cst_23 = arith.constant dense<0.000000e+00> : vector<1xf32>
      %65 = vector.multi_reduction <add>, %64, %cst_23 [1] : vector<1x4xf32> to vector<1xf32>
      %66 = vector.shape_cast %65 : vector<1xf32> to vector<1x1xf32>
      %67 = tpu.reciprocal %66 : vector<1x1xf32> -> vector<1x1xf32>
      %68 = vector.broadcast %67 : vector<1x1xf32> to vector<1x4xf32>
      %69 = arith.mulf %64, %68 : vector<1x4xf32>
      %70 = vector.shape_cast %69 : vector<1x4xf32> to vector<1x1x4xf32>
      %c0_24 = arith.constant 0 : index
      %c0_25 = arith.constant 0 : index
      %c0_26 = arith.constant 0 : index
      %71 = vector.load %arg7[%c0_24, %c0_25, %c0_26] : memref<1x1x4xf32, #tpu.memory_space<vmem>>, vector<1x1x4xf32>
      tpu.vector_store %arg7[%c0_24, %c0_25, %c0_26], %70 {strides = array<i32>} : memref<1x1x4xf32, #tpu.memory_space<vmem>>, vector<1x1x4xf32>,
    } else {
    }
    return
  }
  func.func @transform_0(%arg0: i32, %arg1: i32) -> (i32, i32, i32, i32) {
    %c0_i32 = arith.constant 0 : i32
    %c0_i32_0 = arith.constant 0 : i32
    %c0_i32_1 = arith.constant 0 : i32
    return %arg0, %c0_i32, %arg1, %c0_i32_0 : i32, i32, i32, i32
  }
  func.func @transform_1(%arg0: i32, %arg1: i32) -> (i32, i32) {
    %c0_i32 = arith.constant 0 : i32
    %c0_i32_0 = arith.constant 0 : i32
    %c0_i32_1 = arith.constant 0 : i32
    return %c0_i32, %c0_i32_0 : i32, i32
  }
  func.func @transform_2(%arg0: i32, %arg1: i32) -> (i32, i32) {
    %c0_i32 = arith.constant 0 : i32
    %c0_i32_0 = arith.constant 0 : i32
    %c0_i32_1 = arith.constant 0 : i32
    return %c0_i32, %c0_i32_0 : i32, i32
  }
  func.func @transform_3(%arg0: i32, %arg1: i32) -> (i32, i32) {
    %c0_i32 = arith.constant 0 : i32
    %c0_i32_0 = arith.constant 0 : i32
    %c0_i32_1 = arith.constant 0 : i32
    return %c0_i32, %c0_i32_0 : i32, i32
  }
  func.func @transform_4(%arg0: i32, %arg1: i32) -> (i32, i32) {
    %c0_i32 = arith.constant 0 : i32
    %c0_i32_0 = arith.constant 0 : i32
    %c0_i32_1 = arith.constant 0 : i32
    return %c0_i32, %c0_i32_0 : i32, i32
  }
  func.func @transform_5(%arg0: i32, %arg1: i32) -> (i32, i32, i32) {
    %c0_i32 = arith.constant 0 : i32
    %c0_i32_0 = arith.constant 0 : i32
    %c0_i32_1 = arith.constant 0 : i32
    return %arg0, %c0_i32, %c0_i32_0 : i32, i32, i32
  }
}

</mosaic_0001>

<bundles_post_ra>
// kernel: tpu_custom_call.1
= control target key start
LH: loop header
LB: loop body
LE: loop exit
PB: predicated region body
PF: predicated region fallthrough
CT: control target
= control target key end

     0   :  { %s1085_s0 = inlined_call_operand.hbm [shape: f32[2,4,8,128], index: 0, kind: input, shape index: {}]   ;;  %s1086_s1 = inlined_call_operand.hbm [shape: f32[4,4], index: 1, kind: input, shape index: {}]   ;;  %s1087_s2 = inlined_call_operand.vmem [shape: f32[1,4], index: 2, kind: input, shape index: {}]   ;;  %s1088_s3 = inlined_call_operand.hbm [shape: f32[4,4], index: 3, kind: input, shape index: {}]   ;;  %s1089_s4 = inlined_call_operand.vmem [shape: f32[1,4], index: 4, kind: input, shape index: {}]   ;;  %s1090_s5 = inlined_call_operand.hbm [shape: f32[2,1,4], index: 5, kind: output, shape index: {}]  }
   0x1   :  { %1093 = sst [smem:[#allocation14_spill]] %s1086_s1 }
   0x2   :  { %1094 = sst [smem:[#allocation15_spill]] %s1088_s3 }
   0x3   :  { %10 = vsyncpa [#allocation4], 0 }
   0x4   :  { %12 = vsyncpa [#allocation4 + $0x1], 0 }
   0x5   :  { %13 = vsyncpa [#allocation7], 0 }
   0x6   :  { %14 = vsyncpa [#allocation5], 0 }
   0x7   :  { %16 = vsyncpa [#allocation5 + $0x1], 0  ;;  %s919_s18 = smov 0   ;;  %s921_s19 = smov 0  }
   0x8   :  { %s923_s20 = smov 0   ;;  %s925_s21 = smov 0  }
   0x9   :  { %s927_s22 = smov 0   ;;  %s929_s23 = smov 0  }
   0xa LB: > { %1095 = sst [smem:[#allocation13_spill]] %s878_s23  ;;  %s580_s24 = sadd.s32 4294967295, %s878_s23   ;;  %s878_s23 = sphi %s929_s23, %s22_s23   ;;  %s874_s22 = sphi %s927_s22, %s1111_s22   ;;  %s870_s21 = sphi %s925_s21, %s1110_s21   ;;  %s866_s20 = sphi %s923_s20, %s1109_s20   ;;  %s862_s19 = sphi %s921_s19, %s1108_s19   ;;  %s858_s18 = sphi %s919_s18, %s1107_s18  }
   0xb   : > { %s581_s25 = sadd.s32 4294967294, %s878_s23   ;;  %p50_p0 = scmp.ne.s32.totalorder %s866_s20, %s862_s19 }
   0xc   : > { %p51_p1 = scmp.eq.s32.totalorder %s878_s23, 0  ;;  %p56_p2 = scmp.ne.s32.totalorder %s862_s19, %s858_s18 }
   0xd   : > { %p957_p3 = scmp.eq.s32.totalorder %s580_s24, 0  ;;  %p164_p4 = scmp.eq.s32.totalorder %s580_s24, 1 }
   0xe   : > { %p961_p5 = por %p51_p1, %p50_p0  ;;  %p170_p6 = scmp.eq.s32.totalorder %s581_s25, 1 }
   0xf   : > { %p967_p7 = por %p957_p3, %p56_p2  ;;  %p971_p8 = por %p164_p4, %p50_p0 }
  0x10   : > { %p975_p9 = por %p170_p6, %p56_p2  ;;  %p582_p10 = scmp.ge.s32.totalorder %s878_s23, 1 }
  0x11   : > { %p177_p11 = scmp.lt.s32.totalorder %s878_s23, 3  ;;  %s1101_s1 = sld [smem:[#allocation14_spill]] }
  0x12   : > { %s880_s11 = smov [#allocation6]   ;;  %p585_p13 = scmp.ge.s32.totalorder %s878_s23, 2 }
  0x13   : > { %p984_p12 = pnand %p582_p10, %p177_p11  ;;  %s191_s12 = sshll.u32 %s880_s11, 4  ;;  %s192_s12 = int_to_ptr.vmem [resolvable:$true] %s191_s12 }
  0x14   : > { %p625_p1 = scmp.lt.s32.totalorder %s878_s23, 2  ;;  %s1103_s3 = sld [smem:[#allocation15_spill]] }
  0x15   : > { %p608_p0 = pneg %p984_p12  ;;  %s881_s17 = smov [#allocation8]  }
  0x16   : > { %p999_p4 = pnand %p625_p1, %p961_p5  ;;  %s206_s24 = sshll.u32 %s881_s17, 4  ;;  %s207_s24 = int_to_ptr.vmem [resolvable:$true] %s206_s24 }
  0x17   : > { %s189_s9 = sshll.u32 %s1101_s1, 4  ;;  %p609_p2 = pnand %p608_p0, %p957_p3  ;;  %s190_s9 = int_to_ptr.hbm [resolvable:$true] %s189_s9 }
  0x18   : > { %s220_s25 = sand.u32 1, %s866_s20   ;;  %s34_s7 = sadd.s32 1, %s874_s22 }
  0x19   : > { %611 = dma.hbm_to_vmem [thread:$0]  (!%p609_p2), %s190_s9, 64, %s192_s12, [#allocation7]  }
  0x1a   : > { %s204_s15 = sshll.u32 %s1103_s3, 4  ;;  %s586_s8 = sshll.u32 %s220_s25, 5  ;;  %s205_s15 = int_to_ptr.hbm [resolvable:$true] %s204_s15 }
  0x1b   : > { %614 = dma.hbm_to_vmem [thread:$0]  (!%p609_p2), %s205_s15, 64, %s207_s24, [#allocation7]  }
  0x1c   : > { %p36_p6 = scmp.ge.s32.totalorder %s34_s7, 2  ;;  %s595_s11 = sshll.u32 %s874_s22, 5 }
  0x1d   : > { %s224_s13 = scalar_lea.vmem [#allocation3], %s586_s8  ;;  %s230_s17 = scalar_lea.hbm %s1085_s0, %s595_s11 }
  0x1e   : > { %s233_s28 = sshll.u32 %s224_s13, 4  ;;  %s1113_s7 = smov (%p36_p6, %s34_s7), 0  ;;  %s234_s28 = int_to_ptr.vmem [resolvable:$true] %s233_s28 }
  0x1f   : > { %s38_s9 = ssub.s32 %s874_s22, %s1113_s7  ;;  %s231_s12 = sshll.u32 %s230_s17, 4  ;;  %s232_s12 = int_to_ptr.hbm [resolvable:$true] %s231_s12 }
  0x20   : > { %p41_p5 = scmp.eq.s32.totalorder %s38_s9, 0  ;;  %s1105_s15 = sadd.s32 1, %s866_s20 }
  0x21   : > { %s221_s1 = scalar_lea.sflag [#allocation4], %s220_s25  ;;  %s882_s3 = smov 128  }
  0x22   : > { %s1016_s24 = scalar_select %p41_p5, %s866_s20, %s1105_s15  }
  0x23   : > { %s883_s23 = smov 8   ;;  %245 = sbr.rel (%p984_p12) target bundleno = 974 (0x3ce), region = 40 }
  0x24   : > { %618 = dma.hbm_to_vmem [thread:$0]  (!%p999_p4), %s232_s12, 512, %s234_s28, %s221_s1, %s882_s3, %s882_s3, %s883_s23  }
  0x25   : > { %s1023_s26 = sand.u32 (!%p984_p12), 1, %s862_s19  }
  0x26   : > { %s590_s8 = sshll.u32 (!%p984_p12), %s1023_s26, 5  ;;  %s248_s11 = scalar_lea.sflag (!%p984_p12), [#allocation4], %s1023_s26 }
  0x27   : > { %s251_s13 = scalar_lea.vmem (!%p984_p12), [#allocation3], %s590_s8 }
  0x28   : > { %845 = dma.done.wait (%p967_p7), %s248_s11, 512  }
  0x29   : > { %847 = vsyncadd (%p967_p7), %s248_s11, 4294966784 }
  0x2a   : > { %849 = dma.done.wait (%p957_p3), [#allocation7], 128  }
  0x2b   : > { %851 = vsyncadd (%p957_p3), [#allocation7], 4294967168  ;;  %v294_v0 = vld [vmem:[%s251_s13] sm:$0xff]  ;;  %v296_v1 = vld [vmem:[%s251_s13 + $0x10] sm:$0xff]  ;;  %v311_v6 = vlaneseq  ;;  %vm317_vm0 = vcmask 1041409   ;;  %vm319_vm1 = vcmask 1042434   ;;  %s481_s16 = scalar_lea.hbm %s1090_s5, %s870_s21 }
  0x2c   : > { %298 = vadd.xlane.f32.xlu0 %v294_v0  ;;  %302 = vadd.xlane.f32.xlu1 %v296_v1  ;;  %v295_v2 = vld [vmem:[%s251_s13 + $0x8] sm:$0xff]  ;;  %v297_v3 = vld [vmem:[%s251_s13 + $0x18] sm:$0xff]  ;;  %vm321_vm2 = vcmask 1043459   ;;  %vm324_vm3 = vcmask 60416   ;;  %v884_v18 = vmov 0   ;;  %vm292_vm4 = vcmask 24576  }
  0x2d   : > { %v312_v7 = vand.u32 127, %v311_v6  ;;  %686 = vset.pattern.permute.xlu2 %v884_v18  ;;  %v885_v19 = vmov 0.0   ;;  %v886_v26 = vmov 2   ;;  %v887_v27 = vmov 1   ;;  %v354_v37 = vld [vmem:[#allocation6] sm:$0xf] }
  0x2e   : > { %293 = vst.msk [vmem:[#allocation2] sm:$0x1] %vm292_vm4, %v885_v19  ;;  %688 = vset.pattern.permute.xlu1 %v886_v26  ;;  %687 = vset.pattern.permute.xlu0 %v887_v27  ;;  %v888_v28 = vmov 3   ;;  %v355_v49 = vld [vmem:[%s1087_s2] sm:$0x1]  ;;  %s287_s25 = scalar_lea.vmem [#allocation9], %s1023_s26 }
  0x2f   : > { %v401_v59 = vld [vmem:[#allocation8] sm:$0xf]  ;;  %s483_s28 = sshll.u32 %s287_s25, 4  ;;  %s485_s14 = sshll.u32 %s481_s16, 4  ;;  %s484_s28 = int_to_ptr.vmem [resolvable:$true] %s483_s28  ;;  %s486_s14 = int_to_ptr.hbm [resolvable:$true] %s485_s14 }
  0x30   : > { %s473_s17 = scalar_lea.sflag [#allocation5], %s1023_s26  ;;  %s806_s9 = sshra.s32 %s486_s14, 4  ;;  %s807_s9 = int_to_ptr.hbm [resolvable:$true] %s806_s9 }
  0x31   : > { %s808_s21 = scalar_lea.hbm %s807_s9, 1  ;;  %s812_s8 = scalar_lea.hbm %s1090_s5, 2 }
  0x32   : > { %p809_p3 = scmp.ne.s32.totalorder %s807_s9, %s808_s21  ;;  %p813_p11 = scmp.lt.s32.totalorder %s807_s9, %s1090_s5 }
  0x33   : > { %p814_p12 = scmp.lt.s32.totalorder %s812_s8, %s808_s21 }
  0x34   : > { %300 = vadd.xlane.f32.xlu0 %v295_v2  ;;  %304 = vadd.xlane.f32.xlu1 %v297_v3  ;;  %p810_p7 = pnand %p809_p3, %p971_p8 }
  0x35   : > { %v306_v30 = vld [vmem:[#allocation2] sm:$0x1]  ;;  %p815_p0 = por %p814_p12, %p813_p11 }
  0x36   : > { %p811_p10 = pneg %p810_p7 }
  0x38   : > { %p816_p1 = pnand %p815_p0, %p811_p10 }
  0x9f   : > { %v299_v4 = vpop.xlane.xlu0 %298  ;;  %v303_v5 = vpop.xlane.xlu1 %302 }
  0xa0   : > { %v313_v10 = vperm.slane %v299_v4, %v312_v7  ;;  %v315_v13 = vperm.slane %v303_v5, %v312_v7 }
  0xa7   : > { %v301_v8 = vpop.xlane.xlu0 %300  ;;  %v305_v9 = vpop.xlane.xlu1 %304 }
  0xa8   : > { %v314_v11 = vperm.slane %v301_v8, %v312_v7  ;;  %v316_v12 = vperm.slane %v305_v9, %v312_v7 }
  0xaa   : > { %v318_v14 = vsel %vm317_vm0, %v314_v11, %v313_v10 }
  0xab   : > { %v320_v15 = vsel %vm319_vm1, %v315_v13, %v318_v14 }
  0xac   : > { %v322_v16 = vsel %vm321_vm2, %v316_v12, %v320_v15 }
  0xad   : > { %v325_v17 = vsel %vm324_vm3, %v322_v16, 0.0 }
  0xae   : > { %326 = vadd.xlane.f32.xlu2 %v325_v17 }
 0x121   : > { %v327_v20 = vpop.xlane.xlu2 %326 }
 0x122   : > { %v329_v21 = vperm.slane %v327_v20, 0  ;;  %v330_v22 = vperm.slane %v327_v20, 1  ;;  %v331_v23 = vperm.slane %v327_v20, 2  ;;  %v332_v24 = vperm.slane %v327_v20, 3 }
 0x124   : > { %333 = vst [vmem:[#allocation1] ss:$9 sm:$0xff] %v329_v21 }
 0x125   : > { %335 = vst [vmem:[#allocation1 + $0x1] ss:$9 sm:$0xff] %v330_v22 }
 0x126   : > { %337 = vst [vmem:[#allocation1 + $0x2] ss:$9 sm:$0xff] %v331_v23 }
 0x127   : > { %339 = vst [vmem:[#allocation1 + $0x3] ss:$9 sm:$0xff] %v332_v24 }
 0x12e   : > { %v340_v25 = vld [vmem:[#allocation1] sm:$0xff] }
 0x12f   : > { %342 = vperm.xlu2 %686, %v340_v25  }
 0x137   : > { %689 = vset.pattern.permute.xlu2 %v888_v28 }
 0x189   : > { %v343_v29 = vpop.permute.xlu2 %342 }
 0x18a   : > { %v344_v31 = vperm.slane %v343_v29, %v312_v7  ;;  %v402_v7 = vld [vmem:[%s1089_s4] sm:$0x1] }
 0x18c   : > { %v346_v32 = vadd.f32 %v344_v31, %v306_v30 }
 0x18e   : > { %348 = vst.msk [vmem:[#allocation2] sm:$0x1] %vm292_vm4, %v346_v32 }
 0x195   : > { %v352_v33 = vld [vmem:[#allocation2] sm:$0x1] }
 0x196   : > { %v353_v34 = vmul.f32 0.001953125, %v352_v33 }
 0x198   : > { %389 = vperm.xlu2 %689, %v353_v34   ;;  %377 = vperm.xlu1 %688, %v353_v34  }
 0x199   : > { %365 = vperm.xlu0 %687, %v353_v34  }
 0x1a0   : > { %690 = vset.pattern.permute.xlu2 %v884_v18  ;;  %691 = vset.pattern.permute.xlu1 %v887_v27 }
 0x1a1   : > { %358 = vperm.xlu2 %690, %v353_v34   ;;  %694 = vset.pattern.permute.xlu0 %v884_v18 }
 0x1a9   : > { %692 = vset.pattern.permute.xlu2 %v886_v26 }
 0x1f2   : > { %v390_v38 = vpop.permute.xlu2 %389 }
 0x1f3   : > { %v392_v45 = vperm.slane %v390_v38, 0 }
 0x1f5   : > { %v393_v47 = vmul.f32 %v392_v45, %v354_v37 }
 0x1fb   : > { %v359_v43 = vpop.permute.xlu2 %358 }
 0x1fc   : > { %v361_v46 = vperm.slane %v359_v43, 0 }
 0x1fe   : > { %v362_v48 = vmul.f32 %v361_v46, %v354_v37 }
 0x200   : > { %v363_v51 = vadd.f32 %v362_v48, %v355_v49 }
 0x20a   : > { %v378_v40 = vpop.permute.xlu1 %377 }
 0x20b   : > { %v366_v35 = vpop.permute.xlu0 %365  ;;  %v380_v41 = vperm.slane %v378_v40, 0 }
 0x20c   : > { %v368_v36 = vperm.slane %v366_v35, 0 }
 0x20d   : > { %v381_v42 = vmul.f32 %v380_v41, %v354_v37 }
 0x20e   : > { %v369_v39 = vmul.f32 %v368_v36, %v354_v37 }
 0x210   : > { %371 = vst [vmem:[#allocation1] sm:$0xff] %v369_v39 }
 0x217   : > { %v373_v44 = vld [vmem:[#allocation1 + $0x1] ss:$9 sm:$0xff] }
 0x218   : > { %383 = vst [vmem:[#allocation1] sm:$0xff] %v381_v42  ;;  %v375_v52 = vadd.f32 %v373_v44, %v363_v51 }
 0x21f   : > { %v385_v50 = vld [vmem:[#allocation1 + $0x2] ss:$9 sm:$0xff] }
 0x220   : > { %395 = vst [vmem:[#allocation1] sm:$0xff] %v393_v47  ;;  %v387_v53 = vadd.f32 %v385_v50, %v375_v52 }
 0x227   : > { %v397_v54 = vld [vmem:[#allocation1 + $0x3] ss:$9 sm:$0xff] }
 0x228   : > { %v399_v55 = vadd.f32 %v397_v54, %v387_v53 }
 0x22a   : > { %696 = vtanh.f32 %v399_v55 }
 0x230   : > { %v697_v56 = vpop.eup %696 }
 0x231   : > { %405 = vperm.xlu0 %694, %v697_v56   ;;  %424 = vperm.xlu2 %692, %v697_v56  }
 0x232   : > { %412 = vperm.xlu1 %691, %v697_v56  }
 0x239   : > { %695 = vset.pattern.permute.xlu0 %v888_v28 }
 0x23a   : > { %693 = vset.pattern.permute.xlu1 %v888_v28 }
 0x23b   : > { %436 = vperm.xlu1 %693, %v697_v56  }
 0x28b   : > { %v425_v61 = vpop.permute.xlu2 %424 }
 0x28c   : > { %v427_v62 = vperm.slane %v425_v61, 0 }
 0x28e   : > { %v428_v63 = vmul.f32 %v427_v62, %v401_v59 }
 0x2a3   : > { %v406_v0 = vpop.permute.xlu0 %405 }
 0x2a4   : > { %v413_v57 = vpop.permute.xlu1 %412  ;;  %v408_v3 = vperm.slane %v406_v0, 0 }
 0x2a5   : > { %v415_v58 = vperm.slane %v413_v57, 0 }
 0x2a6   : > { %v409_v5 = vmul.f32 %v408_v3, %v401_v59 }
 0x2a7   : > { %v416_v60 = vmul.f32 %v415_v58, %v401_v59 }
 0x2a8   : > { %v410_v9 = vadd.f32 %v409_v5, %v402_v7 }
 0x2a9   : > { %418 = vst [vmem:[#allocation1] sm:$0xff] %v416_v60 }
 0x2ad   : > { %v437_v1 = vpop.permute.xlu1 %436 }
 0x2ae   : > { %v439_v4 = vperm.slane %v437_v1, 0 }
 0x2b0   : > { %v420_v2 = vld [vmem:[#allocation1 + $0x1] ss:$9 sm:$0xff]  ;;  %v440_v6 = vmul.f32 %v439_v4, %v401_v59 }
 0x2b1   : > { %430 = vst [vmem:[#allocation1] sm:$0xff] %v428_v63  ;;  %v422_v10 = vadd.f32 %v420_v2, %v410_v9 }
 0x2b8   : > { %v432_v8 = vld [vmem:[#allocation1 + $0x2] ss:$9 sm:$0xff] }
 0x2b9   : > { %442 = vst [vmem:[#allocation1] sm:$0xff] %v440_v6  ;;  %v434_v11 = vadd.f32 %v432_v8, %v422_v10 }
 0x2c0   : > { %v444_v12 = vld [vmem:[#allocation1 + $0x3] ss:$9 sm:$0xff] }
 0x2c1   : > { %v446_v13 = vadd.f32 %v444_v12, %v434_v11 }
 0x2c3   : > { %v447_v14 = vsel %vm292_vm4, %v446_v13, -inf }
 0x2c4   : > { %448 = vmax.xlane.f32.xlu2 %v447_v14 }
 0x337   : > { %v449_v15 = vpop.xlane.xlu2 %448 }
 0x338   : > { %v450_v16 = vsub.f32 %v446_v13, %v449_v15 }
 0x33a   : > { %v451_v17 = vmul.f32 1.442695, %v450_v16 }
 0x33c   : > { %698 = vpow2.f32 %v451_v17 }
 0x342   : > { %v699_v18 = vpop.eup %698 }
 0x343   : > { %v453_v19 = vsel %vm292_vm4, %v699_v18, 0.0 }
 0x344   : > { %454 = vadd.xlane.f32.xlu1 %v453_v19 }
 0x3b7   : > { %v455_v20 = vpop.xlane.xlu1 %454 }
 0x3b8   : > { %700 = vrcp.f32 %v455_v20  ;;  %v467_v24 = vand.u32 2147483648, %v455_v20  ;;  %v465_v26 = vand.u32 2147483647, %v455_v20  ;;  %vm461_vm6 = vweird.f32 %v455_v20 }
 0x3ba   : > { %v468_v28 = vor.u32 1.1754944e-38, %v467_v24  ;;  %vm466_vm8 = vcmp.eq.f32.partialorder %v465_v26, 8.507059e+37 }
 0x3be   : > { %v701_v21 = vpop.eup %700 }
 0x3bf   : > { %v457_v22 = vmul.f32 %v701_v21, %v455_v20  ;;  %vm462_vm5 = vweird.f32 %v701_v21 }
 0x3c0   : > { %vm463_vm7 = vmor %vm461_vm6, %vm462_vm5 }
 0x3c1   : > { %v458_v23 = vsub.f32 1.0, %v457_v22 }
 0x3c3   : > { %v459_v25 = vmul.f32 %v701_v21, %v458_v23 }
 0x3c5   : > { %v460_v27 = vadd.f32 %v701_v21, %v459_v25 }
 0x3c7   : > { %v464_v29 = vsel %vm463_vm7, %v701_v21, %v460_v27 }
 0x3c8   : > { %v469_v30 = vsel %vm466_vm8, %v468_v28, %v464_v29 }
 0x3c9   : > { %v470_v31 = vmul.f32 %v699_v18, %v469_v30 }
 0x3cb   : > { %471 = vst.msk [vmem:[%s287_s25] sm:$0x1] %vm292_vm4, %v470_v31 }
 0x3cc   : > { %819 = shalt.err (!%p816_p1)
}
 0x3cd   : > { %606 = dma.vmem_to_hbm [thread:$0]  (%p971_p8), %s484_s28, 16, %s486_s14, %s473_s17  }
 0x3ce PF: > { %s1106_s26 = sld [smem:[#allocation13_spill]]  ;;  %s497_s1 = sand.u32 1, %s858_s18  }
 0x3cf   : > { %p620_p2 = pnand %p585_p13, %p975_p9  ;;  %s498_s3 = scalar_lea.sflag [#allocation5], %s497_s1 }
 0x3d1   : > { %p621_p4 = pneg %p620_p2 }
 0x3d3   : > { %853 = dma.done.wait (%p621_p4), %s498_s3, 16  }
 0x3d4   : > { %855 = vsyncadd (%p621_p4), %s498_s3, 4294967280  ;;  %s22_s23 = sadd.s32 1, %s1106_s26   ;;  %s1107_s18 = smov %s862_s19 }
 0x3d5   : > { %p19_p6 = scmp.ge.s32.totalorder %s22_s23, 4   ;;  %s1108_s19 = smov %s866_s20 }
 0x3d6   : > { %s1109_s20 = smov %s1016_s24  ;;  %s1110_s21 = smov %s874_s22 }
 0x3d7   : > { %s1111_s22 = smov %s1113_s7  ;;  %21 = sbr.rel (!%p19_p6) target bundleno = 10 (0xa), region = 110 }
 0x3dc   :  { %503 = vsyncpa [#allocation4], 1 }
 0x3dd   :  { %505 = vsyncpa [#allocation4 + $0x1], 1 }
 0x3de   :  { %506 = vsyncpa [#allocation7], 1 }
 0x3df   :  { %507 = vsyncpa [#allocation5], 1 }
 0x3e0   :  { %509 = vsyncpa [#allocation5 + $0x1], 1 }

</bundles_post_ra>
